<compile_context>
chip_gen: v7x
topology: tpu7x:2x2x1
jax: 0.10.0
libtpu: 0.0.40
codegen_flags: <defaults>
</compile_context>

<pallas_src>
import jax
import jax.numpy as jnp
from jax.experimental import pallas as pl
from jax.experimental.pallas import tpu as pltpu


def mlp_kernel(x_ref, w1_ref, b1_ref, w2_ref, b2_ref, o_ref):
    # In-kernel cast of the activation tile to bf16 (weights already bf16).
    x = x_ref[...].astype(jnp.bfloat16)                       # (TB, in)
    # linear1: (TB, in) @ (in, H) -> (TB, H), f32 accumulation on the MXU.
    h = jnp.dot(x, w1_ref[...], preferred_element_type=jnp.float32)
    h = jnp.maximum(h + b1_ref[...], 0.0)                     # bias + ReLU (f32 VPU)
    # linear2: (TB, H) @ (H, Opad) -> (TB, Opad), f32 accumulation.
    out = jnp.dot(h.astype(jnp.bfloat16), w2_ref[...],
                  preferred_element_type=jnp.float32)
    o_ref[...] = (out + b2_ref[...]).astype(o_ref.dtype)


def prepare_params(w1, b1, w2, b2):
    """One-time parameter prep (do NOT call per inference).

    w1: (hidden, in), w2: (out, hidden) in PyTorch nn.Linear layout.
    Returns kernel-ready arrays:
      w1_t (in, hidden) bf16, b1_row (1, hidden) f32,
      w2_t (hidden, out_pad) bf16, b2_row (1, out_pad) f32, out_size (int).
    """
    hidden, in_size = w1.shape
    out_size = w2.shape[0]
    out_pad = max(128, ((out_size + 127) // 128) * 128)

    w1_t = jnp.transpose(w1).astype(jnp.bfloat16)              # (in, hidden)
    b1_row = b1.reshape(1, hidden).astype(jnp.float32)
    w2_t = jnp.pad(jnp.transpose(w2),                           # (hidden, out_pad)
                   ((0, 0), (0, out_pad - out_size))).astype(jnp.bfloat16)
    b2_row = jnp.pad(b2, (0, out_pad - out_size)).reshape(1, out_pad).astype(
        jnp.float32)
    return w1_t, b1_row, w2_t, b2_row, out_size


def mnist_model_forward(x_nchw, params, *, num_batch_tiles=1):
    """x_nchw: (B, C, H, W) float32. params: output of prepare_params.
    num_batch_tiles=1 for single-TC v5e/v6e; 2 (even) for v7x at large B.
    Returns logits (B, out_size) float32."""
    w1_t, b1_row, w2_t, b2_row, out_size = params
    in_size, hidden = w1_t.shape
    out_pad = w2_t.shape[1]

    B = x_nchw.shape[0]
    x = x_nchw.reshape(B, -1)                                   # xb.view(B, -1)
    assert x.shape[1] == in_size

    # Batch tile: multiple of 8 sublanes, num_batch_tiles tiles total.
    tb = ((-(-B // num_batch_tiles)) + 7) // 8 * 8
    b_pad = tb * num_batch_tiles
    if b_pad != B:
        # No-op when B is already a multiple of 8 * num_batch_tiles.
        x = jnp.pad(x, ((0, b_pad - B), (0, 0)))
    nb = num_batch_tiles

    out_padded = pl.pallas_call(
        mlp_kernel,
        out_shape=jax.ShapeDtypeStruct((b_pad, out_pad), jnp.float32),
        grid=(nb,),
        in_specs=[
            pl.BlockSpec((tb, in_size), lambda i: (i, 0)),        # x tile (f32)
            pl.BlockSpec((in_size, hidden), lambda i: (0, 0)),    # W1^T resident
            pl.BlockSpec((1, hidden), lambda i: (0, 0)),          # b1 resident
            pl.BlockSpec((hidden, out_pad), lambda i: (0, 0)),    # W2^T resident
            pl.BlockSpec((1, out_pad), lambda i: (0, 0)),         # b2 resident
        ],
        out_specs=pl.BlockSpec((tb, out_pad), lambda i: (i, 0)),
        compiler_params=pltpu.CompilerParams(
            dimension_semantics=("parallel",)),                   # shard B tiles (v7x)
    )(x, w1_t, b1_row, w2_t, b2_row)

    return out_padded[:B, :out_size]


def _torch_like_linear_init(key, out_features, in_features):
    """nn.Linear default init: U(-1/sqrt(fan_in), 1/sqrt(fan_in)) for W and b."""
    kw, kb = jax.random.split(key)
    bound = 1.0 / (in_features ** 0.5)
    w = jax.random.uniform(kw, (out_features, in_features), jnp.float32,
                           -bound, bound)
    b = jax.random.uniform(kb, (out_features,), jnp.float32, -bound, bound)
    return w, b


if __name__ == "__main__":
    # MNIST-like sizes, small batch (multiple of 8 so the pad path is a no-op).
    batch = 8
    C, H, W = 1, 28, 28
    in_size = C * H * W          # 784
    hidden_size = 32
    out_size = 10

    key = jax.random.PRNGKey(0)
    k_x, k_l1, k_l2 = jax.random.split(key, 3)

    x = jax.random.normal(k_x, (batch, C, H, W), jnp.float32)
    w1, b1 = _torch_like_linear_init(k_l1, hidden_size, in_size)
    w2, b2 = _torch_like_linear_init(k_l2, out_size, hidden_size)

    # One-time weight prep (cast/transpose/pad) — reused across calls.
    params = jax.block_until_ready(prepare_params(w1, b1, w2, b2))

    logits = mnist_model_forward(x, params)
    logits = jax.block_until_ready(logits)

    # Reference check in plain JAX (f32 math); bf16 matmul path -> loose tol.
    xf = x.reshape(batch, -1)
    ref = jnp.maximum(xf @ w1.T + b1, 0.0) @ w2.T + b2
    assert logits.shape == (batch, out_size)
    assert jnp.allclose(logits, ref, atol=3e-2, rtol=3e-2), float(
        jnp.max(jnp.abs(logits - ref)))

    print("KERNEL_OK")
</pallas_src>

<mosaic_0001>
module attributes {stable_mosaic.version = 11 : i64} {
  func.func @mlp_kernel(%arg0: i32, %arg1: memref<8x784xf32, #tpu.memory_space<vmem>>, %arg2: memref<784x32xbf16, #tpu.memory_space<vmem>>, %arg3: memref<1x32xf32, #tpu.memory_space<vmem>>, %arg4: memref<32x128xbf16, #tpu.memory_space<vmem>>, %arg5: memref<1x128xf32, #tpu.memory_space<vmem>>, %arg6: memref<8x128xf32, #tpu.memory_space<vmem>>) attributes {dimension_semantics = [#tpu.dimension_semantics<parallel>], iteration_bounds = array<i64: 1>, scalar_prefetch = 0 : i64, scratch_operands = 0 : i64, tpu.core_type = #tpu.core_type<tc>, window_params = [{transform_indices = @transform_0, window_bounds = array<i64: 8, 784>}, {pipeline_mode = #tpu.pipeline_mode<synchronous>, transform_indices = @transform_1, window_bounds = array<i64: 784, 32>}, {pipeline_mode = #tpu.pipeline_mode<synchronous>, transform_indices = @transform_2, window_bounds = array<i64: 1, 32>}, {pipeline_mode = #tpu.pipeline_mode<synchronous>, transform_indices = @transform_3, window_bounds = array<i64: 32, 128>}, {pipeline_mode = #tpu.pipeline_mode<synchronous>, transform_indices = @transform_4, window_bounds = array<i64: 1, 128>}, {transform_indices = @transform_5, window_bounds = array<i64: 8, 128>}]} {
    %c0 = arith.constant 0 : index
    %c0_0 = arith.constant 0 : index
    %0 = vector.load %arg1[%c0, %c0_0] : memref<8x784xf32, #tpu.memory_space<vmem>>, vector<8x784xf32>
    %1 = arith.truncf %0 : vector<8x784xf32> to vector<8x784xbf16>
    %c0_1 = arith.constant 0 : index
    %c0_2 = arith.constant 0 : index
    %2 = vector.load %arg2[%c0_1, %c0_2] : memref<784x32xbf16, #tpu.memory_space<vmem>>, vector<784x32xbf16>
    %cst = arith.constant dense<0.000000e+00> : vector<8x32xf32>
    %3 = tpu.matmul %1, %2, %cst {dimension_numbers = #tpu.dot_dimension_numbers<[1], [0], [0], [1], [0, 0, 1, 1], [], []>} : vector<8x784xbf16>, vector<784x32xbf16>, vector<8x32xf32> -> vector<8x32xf32>
    %c0_3 = arith.constant 0 : index
    %c0_4 = arith.constant 0 : index
    %4 = vector.load %arg3[%c0_3, %c0_4] : memref<1x32xf32, #tpu.memory_space<vmem>>, vector<1x32xf32>
    %5 = vector.broadcast %4 : vector<1x32xf32> to vector<8x32xf32>
    %6 = arith.addf %3, %5 : vector<8x32xf32>
    %cst_5 = arith.constant 0.000000e+00 : f32
    %7 = vector.broadcast %cst_5 : f32 to vector<8x32xf32>
    %8 = arith.maximumf %6, %7 : vector<8x32xf32>
    %9 = arith.truncf %8 : vector<8x32xf32> to vector<8x32xbf16>
    %c0_6 = arith.constant 0 : index
    %c0_7 = arith.constant 0 : index
    %10 = vector.load %arg4[%c0_6, %c0_7] : memref<32x128xbf16, #tpu.memory_space<vmem>>, vector<32x128xbf16>
    %cst_8 = arith.constant dense<0.000000e+00> : vector<8x128xf32>
    %11 = tpu.matmul %9, %10, %cst_8 {dimension_numbers = #tpu.dot_dimension_numbers<[1], [0], [0], [1], [0, 0, 1, 1], [], []>} : vector<8x32xbf16>, vector<32x128xbf16>, vector<8x128xf32> -> vector<8x128xf32>
    %c0_9 = arith.constant 0 : index
    %c0_10 = arith.constant 0 : index
    %12 = vector.load %arg5[%c0_9, %c0_10] : memref<1x128xf32, #tpu.memory_space<vmem>>, vector<1x128xf32>
    %13 = vector.broadcast %12 : vector<1x128xf32> to vector<8x128xf32>
    %14 = arith.addf %11, %13 : vector<8x128xf32>
    %c0_11 = arith.constant 0 : index
    %c0_12 = arith.constant 0 : index
    %15 = vector.load %arg6[%c0_11, %c0_12] : memref<8x128xf32, #tpu.memory_space<vmem>>, vector<8x128xf32>
    tpu.vector_store %arg6[%c0_11, %c0_12], %14 {strides = array<i32>} : memref<8x128xf32, #tpu.memory_space<vmem>>, vector<8x128xf32>,
    return
  }
  func.func @transform_0(%arg0: i32) -> (i32, i32) {
    %c0_i32 = arith.constant 0 : i32
    %c0_i32_0 = arith.constant 0 : i32
    return %arg0, %c0_i32 : i32, i32
  }
  func.func @transform_1(%arg0: i32) -> (i32, i32) {
    %c0_i32 = arith.constant 0 : i32
    %c0_i32_0 = arith.constant 0 : i32
    %c0_i32_1 = arith.constant 0 : i32
    return %c0_i32, %c0_i32_0 : i32, i32
  }
  func.func @transform_2(%arg0: i32) -> (i32, i32) {
    %c0_i32 = arith.constant 0 : i32
    %c0_i32_0 = arith.constant 0 : i32
    %c0_i32_1 = arith.constant 0 : i32
    return %c0_i32, %c0_i32_0 : i32, i32
  }
  func.func @transform_3(%arg0: i32) -> (i32, i32) {
    %c0_i32 = arith.constant 0 : i32
    %c0_i32_0 = arith.constant 0 : i32
    %c0_i32_1 = arith.constant 0 : i32
    return %c0_i32, %c0_i32_0 : i32, i32
  }
  func.func @transform_4(%arg0: i32) -> (i32, i32) {
    %c0_i32 = arith.constant 0 : i32
    %c0_i32_0 = arith.constant 0 : i32
    %c0_i32_1 = arith.constant 0 : i32
    return %c0_i32, %c0_i32_0 : i32, i32
  }
  func.func @transform_5(%arg0: i32) -> (i32, i32) {
    %c0_i32 = arith.constant 0 : i32
    %c0_i32_0 = arith.constant 0 : i32
    return %arg0, %c0_i32 : i32, i32
  }
}

</mosaic_0001>

<bundles_post_ra>
// kernel: tpu_custom_call.1
= control target key start
LH: loop header
LB: loop body
LE: loop exit
PB: predicated region body
PF: predicated region fallthrough
CT: control target
= control target key end

     0   :  { %v901_v44 = vmov 0.0   ;;  %vm902_vm0 = vmmov 0   ;;  %vm435_vm1 = vcmask 130048   ;;  %s1128_s0 = inlined_call_operand.vmem [shape: f32[8,784], index: 0, kind: input, shape index: {}]   ;;  %s1129_s1 = inlined_call_operand.vmem [shape: bf16[784,32], index: 1, kind: input, shape index: {}]   ;;  %s1130_s2 = inlined_call_operand.vmem [shape: f32[1,32], index: 2, kind: input, shape index: {}]   ;;  %s1131_s3 = inlined_call_operand.vmem [shape: bf16[32,128], index: 3, kind: input, shape index: {}]   ;;  %s1132_s4 = inlined_call_operand.vmem [shape: f32[1,128], index: 4, kind: input, shape index: {}]   ;;  %s1133_s5 = inlined_call_operand.hbm [shape: f32[8,128], index: 5, kind: output, shape index: {}]  }
   0x1   :  { %v826_v0 = vld [vmem:[%s1129_s1 + $0x40] sm:$0xff]   ;;  %v830_v4 = vld [vmem:[%s1129_s1 + $0x48] sm:$0xff]   ;;  %v834_v8 = vld [vmem:[%s1129_s1 + $0x50] sm:$0xff]  }
   0x2   :  { %v827_v1 = vld [vmem:[%s1129_s1] sm:$0xff]   ;;  %738 = vmatprep.subr.bf16.mxu0 %v826_v0  ;;  %v831_v5 = vld [vmem:[%s1129_s1 + $0x8] sm:$0xff]   ;;  %v835_v9 = vld [vmem:[%s1129_s1 + $0x10] sm:$0xff]  }
   0x3   :  { %v828_v2 = vld [vmem:[%s1129_s1 + $0xc0] sm:$0xff]   ;;  %739 = vmatpush3.bf16.msra.mxu0 %v827_v1  ;;  %v832_v6 = vld [vmem:[%s1129_s1 + $0xc8] sm:$0xff]   ;;  %v836_v10 = vld [vmem:[%s1129_s1 + $0xd0] sm:$0xff]  }
   0x4   :  { %v829_v3 = vld [vmem:[%s1129_s1 + $0x80] sm:$0xff]   ;;  %760 = vmatprep.subr.bf16.mxu1 %v828_v2  ;;  %740 = vmatprep.subr.bf16.mxu0 %v830_v4  ;;  %v833_v7 = vld [vmem:[%s1129_s1 + $0x88] sm:$0xff]   ;;  %v837_v11 = vld [vmem:[%s1129_s1 + $0x90] sm:$0xff]  }
   0x5   :  { %761 = vmatpush3.bf16.msra.mxu1 %v829_v3  ;;  %v838_v12 = vld [vmem:[%s1129_s1 + $0x58] sm:$0xff]   ;;  %v842_v16 = vld [vmem:[%s1129_s1 + $0x60] sm:$0xff]   ;;  %v846_v20 = vld [vmem:[%s1129_s1 + $0x68] sm:$0xff]  }
   0x6   :  { %762 = vmatprep.subr.bf16.mxu1 %v832_v6  ;;  %v839_v13 = vld [vmem:[%s1129_s1 + $0x18] sm:$0xff]   ;;  %v843_v17 = vld [vmem:[%s1129_s1 + $0x20] sm:$0xff]   ;;  %v847_v21 = vld [vmem:[%s1129_s1 + $0x28] sm:$0xff]  }
   0x7   :  { %741 = vmatpush3.bf16.msra.mxu0 %v831_v5  ;;  %v840_v14 = vld [vmem:[%s1129_s1 + $0xd8] sm:$0xff]   ;;  %v844_v18 = vld [vmem:[%s1129_s1 + $0xe0] sm:$0xff]   ;;  %v848_v22 = vld [vmem:[%s1129_s1 + $0xe8] sm:$0xff]  }
   0x8   :  { %742 = vmatprep.subr.bf16.mxu0 %v834_v8  ;;  %v841_v15 = vld [vmem:[%s1129_s1 + $0x98] sm:$0xff]   ;;  %v845_v19 = vld [vmem:[%s1129_s1 + $0xa0] sm:$0xff]   ;;  %v849_v23 = vld [vmem:[%s1129_s1 + $0xa8] sm:$0xff]  }
   0x9   :  { %763 = vmatpush3.bf16.msra.mxu1 %v833_v7  ;;  %v850_v24 = vld [vmem:[%s1129_s1 + $0x70] sm:$0xff]   ;;  %v854_v28 = vld [vmem:[%s1129_s1 + $0x78] sm:$0xff]   ;;  %v23_v31 = vld [vmem:[%s1128_s0 + $0x8] sm:$0xff] }
   0xa   :  { %764 = vmatprep.subr.bf16.mxu1 %v836_v10  ;;  %v851_v25 = vld [vmem:[%s1129_s1 + $0x30] sm:$0xff]   ;;  %v855_v29 = vld [vmem:[%s1129_s1 + $0x38] sm:$0xff]   ;;  %v30_v32 = vpack.c.bf16 %v23_v31, %v23_v31  ;;  %v22_v34 = vld [vmem:[%s1128_s0] sm:$0xff] }
   0xb   :  { %743 = vmatpush3.bf16.msra.mxu0 %v835_v9  ;;  %v852_v26 = vld [vmem:[%s1129_s1 + $0xf0] sm:$0xff]   ;;  %v856_v30 = vld [vmem:[%s1129_s1 + $0xf8] sm:$0xff]   ;;  %v29_v35 = vpack.c.bf16 %v22_v34, %v22_v34  ;;  %v858_v36 = vld [vmem:[%s1129_s1 + $0x140] sm:$0xff]  }
   0xc   :  { %744 = vmatprep.subr.bf16.mxu0 %v838_v12  ;;  %v853_v27 = vld [vmem:[%s1129_s1 + $0xb0] sm:$0xff]   ;;  %v857_v33 = vld [vmem:[%s1129_s1 + $0xb8] sm:$0xff]   ;;  %471 = vmatprep.mubr.bf16.mxu0 %v30_v32  ;;  %v859_v39 = vld [vmem:[%s1129_s1 + $0x100] sm:$0xff]  }
   0xd   :  { %765 = vmatpush3.bf16.msra.mxu1 %v837_v11  ;;  %v25_v37 = vld [vmem:[%s1128_s0 + $0x18] sm:$0xff]  ;;  %v24_v40 = vld [vmem:[%s1128_s0 + $0x10] sm:$0xff]  ;;  %v860_v42 = vld [vmem:[%s1129_s1 + $0x148] sm:$0xff]  }
   0xe   :  { %766 = vmatprep.subr.bf16.mxu1 %v840_v14  ;;  %v32_v38 = vpack.c.bf16 %v25_v37, %v25_v37  ;;  %v31_v41 = vpack.c.bf16 %v24_v40, %v24_v40  ;;  %v861_v43 = vld [vmem:[%s1129_s1 + $0x108] sm:$0xff]   ;;  %v862_v45 = vld [vmem:[%s1129_s1 + $0x150] sm:$0xff]   ;;  %v864_v47 = vld [vmem:[%s1129_s1 + $0x158] sm:$0xff]  }
   0xf   :  { %745 = vmatpush3.bf16.msra.mxu0 %v839_v13  ;;  %v863_v46 = vld [vmem:[%s1129_s1 + $0x110] sm:$0xff]   ;;  %v865_v48 = vld [vmem:[%s1129_s1 + $0x118] sm:$0xff]   ;;  %v866_v49 = vld [vmem:[%s1129_s1 + $0x160] sm:$0xff]  }
  0x10   :  { %746 = vmatprep.subr.bf16.mxu0 %v842_v16  ;;  %511 = vmatprep.mubr.bf16.mxu1 %v32_v38  ;;  %v867_v50 = vld [vmem:[%s1129_s1 + $0x120] sm:$0xff]   ;;  %v868_v51 = vld [vmem:[%s1129_s1 + $0x168] sm:$0xff]   ;;  %v28_v56 = vld [vmem:[%s1128_s0 + $0x30] sm:$0xff] }
  0x11   :  { %767 = vmatpush3.bf16.msra.mxu1 %v841_v15  ;;  %v869_v52 = vld [vmem:[%s1129_s1 + $0x128] sm:$0xff]   ;;  %v874_v53 = vld [vmem:[%s1129_s1 + $0x180] sm:$0xff]   ;;  %v35_v57 = vpack.c.bf16 %v28_v56, %v28_v56 }
  0x12   :  { %768 = vmatprep.subr.bf16.mxu1 %v844_v18  ;;  %v27_v54 = vld [vmem:[%s1128_s0 + $0x28] sm:$0xff] }
  0x13   :  { %747 = vmatpush3.bf16.msra.mxu0 %v843_v17  ;;  %v34_v55 = vpack.c.bf16 %v27_v54, %v27_v54 }
  0x14   :  { %748 = vmatprep.subr.bf16.mxu0 %v846_v20 }
  0x15   :  { %769 = vmatpush3.bf16.msra.mxu1 %v845_v19 }
  0x16   :  { %770 = vmatprep.subr.bf16.mxu1 %v848_v22 }
  0x17   :  { %749 = vmatpush3.bf16.msra.mxu0 %v847_v21 }
  0x18   :  { %750 = vmatprep.subr.bf16.mxu0 %v850_v24 }
  0x19   :  { %771 = vmatpush3.bf16.msra.mxu1 %v849_v23 }
  0x1a   :  { %772 = vmatprep.subr.bf16.mxu1 %v852_v26 }
  0x1b   :  { %751 = vmatpush3.bf16.msra.mxu0 %v851_v25 }
  0x1c   :  { %752 = vmatprep.subr.bf16.mxu0 %v854_v28 }
  0x1d   :  { %773 = vmatpush3.bf16.msra.mxu1 %v853_v27 }
  0x1e   :  { %774 = vmatprep.subr.bf16.mxu1 %v856_v30 }
  0x1f   :  { %753 = vmatpush3.bf16.msra.mxu0 %v855_v29 }
  0x20   :  { %782 = vmatprep.subr.bf16.mxu0 %v858_v36 }
  0x21   :  { %775 = vmatpush3.bf16.msra.mxu1 %v857_v33 }
  0x22   :  { %472 = vmatmul.mubr.bf16.vlgmr.msra.gmra.mrb[0].mxu0 %v29_v35  ;;  %809 = vmatprep.subr.bf16.mxu1 %v901_v44 }
  0x23   :  { %783 = vmatpush3.bf16.msra.mxu0 %v859_v39 }
  0x24   :  { %512 = vmatmul.mubr.bf16.vlgmr.msra.gmra.mrb[0].mxu1 %v31_v41  ;;  %784 = vmatprep.subr.bf16.mxu0 %v860_v42 }
  0x25   :  { %811 = vmatprep.mubr.msk.bf16.mxu1 %vm902_vm0, %v901_v44  ;;  %810 = vmatpush3.bf16.msra.mxu1 %v874_v53 }
  0x27   :  { %785 = vmatpush3.bf16.msra.mxu0 %v861_v43 }
  0x28   :  { %786 = vmatprep.subr.bf16.mxu0 %v862_v45 }
  0x2b   :  { %787 = vmatpush3.bf16.msra.mxu0 %v863_v46 }
  0x2c   :  { %788 = vmatprep.subr.bf16.mxu0 %v864_v47 }
  0x2f   :  { %789 = vmatpush3.bf16.msra.mxu0 %v865_v48 }
  0x30   :  { %790 = vmatprep.subr.bf16.mxu0 %v866_v49 }
  0x33   :  { %791 = vmatpush3.bf16.msra.mxu0 %v867_v50 }
  0x34   :  { %10 = vsyncpa [#allocation3], 0  ;;  %792 = vmatprep.subr.bf16.mxu0 %v868_v51  ;;  %v870_v58 = vld [vmem:[%s1129_s1 + $0x170] sm:$0xff]   ;;  %551 = vmatprep.mubr.bf16.mxu0 %v34_v55  ;;  %v872_v60 = vld [vmem:[%s1129_s1 + $0x178] sm:$0xff]   ;;  %vm624_vm2 = vcmask 261120  }
  0x35   :  { %815 = vmatprep.subr.bf16.mxu1 %v901_v44  ;;  %812 = vmatmul.mubr.msk.bf16.vlgmr.msra.gmra.mrb[4].mxu1 %vm435_vm1, %v35_v57  ;;  %v871_v59 = vld [vmem:[%s1129_s1 + $0x130] sm:$0xff]   ;;  %v873_v61 = vld [vmem:[%s1129_s1 + $0x138] sm:$0xff]   ;;  %v26_v62 = vld [vmem:[%s1128_s0 + $0x20] sm:$0xff] }
  0x36   :  { %819 = vmatprep.mubr.msk.bf16.mxu1 %vm902_vm0, %v901_v44  ;;  %v33_v63 = vpack.c.bf16 %v26_v62, %v26_v62  ;;  %v875_v0 = vld [vmem:[%s1131_s3] sm:$0xff]   ;;  %v876_v1 = vld [vmem:[%s1131_s3 + $0x8] sm:$0xff]   ;;  %s903_s3 = smov [#allocation2]  }
  0x37   :  { %793 = vmatpush3.bf16.msra.mxu0 %v869_v52  ;;  %816 = vmatpush3.bf16.msra.mxu1 %v875_v0  ;;  %v683_v3 = vld [vmem:[%s1130_s2] ss:$0 sm:$0xff]  ;;  %s675_s10 = sshll.u32 %s903_s3, 4  ;;  %s676_s10 = int_to_ptr.vmem [resolvable:$true] %s675_s10 }
  0x38   :  { %794 = vmatprep.subr.bf16.mxu0 %v870_v58  ;;  %817 = vmatprep.subr.bf16.mxu1 %v901_v44  ;;  %v734_v28 = vld [vmem:[%s1132_s4] ss:$0 sm:$0xff]  ;;  %s877_s11 = scalar_lea.vmem %s676_s10, 128  ;;  %p882_p1 = scmp.lt.s32.totalorder %s676_s10, %s676_s10 }
  0x39   :  { %p878_p0 = scmp.ne.s32.totalorder %s676_s10, %s877_s11  ;;  %p883_p2 = scmp.lt.s32.totalorder %s877_s11, %s877_s11 }
  0x3b   :  { %795 = vmatpush3.bf16.msra.mxu0 %v871_v59  ;;  %818 = vmatpush3.bf16.msra.mxu1 %v876_v1  ;;  %p884_p3 = por %p883_p2, %p882_p1 }
  0x3c   :  { %796 = vmatprep.subr.bf16.mxu0 %v872_v60 }
  0x3d   :  { %p885_p4 = pnand %p884_p3, %p878_p0 }
  0x3f   :  { %797 = vmatpush3.bf16.msra.mxu0 %v873_v61 }
  0x42   :  { %552 = vmatmul.mubr.bf16.vlgmr.msra.gmra.mrb[4].mxu0 %v33_v63 }
  0xf5   :  { %v754_v2 = vpop.f32.mrb[0].mxu0 }
  0xf6   :  { %v755_v4 = vpop.f32.mrb[1].mxu0 }
  0xf7   :  { %v756_v5 = vadd.f32 %v755_v4, %v754_v2  ;;  %v757_v6 = vpop.f32.mrb[2].mxu0  ;;  %v776_v7 = vpop.f32.mrb[0].mxu1 }
  0xf8   :  { %v758_v8 = vpop.f32.mrb[3].mxu0  ;;  %v777_v10 = vpop.f32.mrb[1].mxu1 }
  0xf9   :  { %v474_v9 = vadd.f32 %v756_v5, %v683_v3  ;;  %v778_v11 = vadd.f32 %v777_v10, %v776_v7  ;;  %v779_v12 = vpop.f32.mrb[2].mxu1 }
  0xfa   :  { %v780_v13 = vpop.f32.mrb[3].mxu1 }
  0xfb   :  { %v514_v14 = vadd.f32 %v778_v11, %v474_v9 }
 0x108   :  { %v593_v15 = vpop.f32.mrb[4].mxu1 }
 0x109   :  { %v813_v16 = vpop.f32.mrb[5].mxu1 }
 0x10a   :  { %v596_v17 = vpop.f32.mrb[6].mxu1 }
 0x10b   :  { %v814_v18 = vpop.f32.mrb[7].mxu1 }
 0x115   :  { %v798_v19 = vpop.f32.mrb[4].mxu0 }
 0x116   :  { %v799_v20 = vpop.f32.mrb[5].mxu0 }
 0x117   :  { %v800_v21 = vadd.f32 %v799_v20, %v798_v19  ;;  %v801_v22 = vpop.f32.mrb[6].mxu0 }
 0x118   :  { %v802_v23 = vpop.f32.mrb[7].mxu0 }
 0x119   :  { %v554_v24 = vadd.f32 %v800_v21, %v514_v14 }
 0x11b   :  { %v594_v25 = vadd.f32 %v593_v15, %v554_v24 }
 0x11d   :  { %v599_v26 = vmax.f32 %v594_v25, 0.0 }
 0x11f   :  { %v600_v27 = vpack.c.bf16 %v599_v26, %v599_v26 }
 0x121   :  { %820 = vmatmul.mubr.msk.bf16.vlgmr.msra.gmra.mrb[8].mxu1 %vm624_vm2, %v600_v27 }
 0x1f4   :  { %v662_v29 = vpop.f32.mrb[8].mxu1 }
 0x1f5   :  { %v663_v30 = vadd.f32 %v734_v28, %v662_v29  ;;  %v821_v31 = vpop.f32.mrb[9].mxu1 }
 0x1f6   :  { %v665_v32 = vpop.f32.mrb[10].mxu1 }
 0x1f7   :  { %668 = vst [vmem:[#allocation2] sm:$0xff] %v663_v30  ;;  %v822_v33 = vpop.f32.mrb[11].mxu1 }
 0x1f8   :  { %888 = shalt.err (!%p885_p4)
}
 0x1f9   :  { %s889_s4 = scalar_lea.hbm %s1133_s5, 128 }
 0x1fa   :  { %p890_p5 = scmp.ne.s32.totalorder %s1133_s5, %s889_s4  ;;  %p893_p6 = scmp.lt.u32.totalorder %s889_s4, %s1133_s5 }
 0x1fc   :  { %p895_p7 = pnand %p893_p6, %p890_p5 }
 0x1fe   :  { %898 = shalt.err (!%p895_p7)
}
 0x1ff   :  { %678 = dma.vmem_to_hbm [thread:$0]  %s676_s10, 128, %s1133_s5, [#allocation3]  }
 0x200   :  { %899 = dma.done.wait [#allocation3], 128  }
 0x201   :  { %900 = vsyncadd [#allocation3], 4294967168 }
 0x202   :  { %682 = vsyncpa [#allocation3], 1 }

</bundles_post_ra>
